<compile_context>
chip_gen: v7x
topology: tpu7x:2x2x1
jax: 0.10.0
libtpu: 0.0.40
codegen_flags: <defaults>
</compile_context>

<pallas_src>
import functools

import jax
import jax.numpy as jnp
from jax.experimental import pallas as pl
from jax.experimental.pallas import tpu as pltpu

NEG_SLOPE = 0.01      # F.leaky_relu default negative_slope
LANE = 128            # lane width
SUBLANE_BF16 = 16     # bf16 sublane packing


def _round_up(n, m):
    return (n + m - 1) // m * m


def _mlp_kernel(x_ref, *refs, n_layers):
    """refs = (w0, b0, w1, b1, ..., out_ref).

    x_ref : (TILE_M, D0) bf16 batch tile
    w_i   : (K_i, N_i)   bf16, whole array, grid-invariant (VMEM resident)
    b_i   : (1,  N_i)    f32
    out   : (TILE_M, N_last) f32
    """
    out_ref = refs[-1]
    h = x_ref[...]                                       # bf16
    for i in range(n_layers):
        w = refs[2 * i][...]                             # bf16
        b = refs[2 * i + 1][...]                         # f32 (1, N)
        y = jnp.dot(h, w, preferred_element_type=jnp.float32) + b
        y = jnp.where(y > 0, y, NEG_SLOPE * y)           # leaky_relu
        if i + 1 < n_layers:
            h = y.astype(jnp.bfloat16)                   # bf16 feed to next MXU pass
        else:
            out_ref[...] = y.astype(out_ref.dtype)       # f32, lane-dense store


def wolpertinger_actor_slate_forward(x, params, *, max_tile_m=512):
    """x: (batch, input_dim) f32.  params: list of (W (in,out) f32, b (1,out) f32)."""
    batch, in_dim = x.shape
    n_layers = len(params)
    out_dim = params[-1][0].shape[1]

    # ---- padded (hardware-friendly) dims ---------------------------------
    in_pad = _round_up(in_dim, LANE)
    n_pads = [_round_up(w.shape[1], LANE) for w, _ in params]
    k_pads = [in_pad] + n_pads[:-1]
    out_pad = n_pads[-1]

    tile_m = min(max_tile_m, _round_up(batch, SUBLANE_BF16))
    padded_batch = _round_up(batch, tile_m)
    grid = (padded_batch // tile_m,)

    # ---- zero-pad inputs / params; weights + activations in bf16 ----------
    xp = jnp.zeros((padded_batch, in_pad), jnp.float32).at[:batch, :in_dim].set(x)
    xp = xp.astype(jnp.bfloat16)

    flat_inputs = [xp]
    in_specs = [pl.BlockSpec((tile_m, in_pad), lambda i: (i, 0))]
    for (w, b), kp, npad in zip(params, k_pads, n_pads):
        wp = jnp.zeros((kp, npad), jnp.float32).at[: w.shape[0], : w.shape[1]].set(w)
        bp = jnp.zeros((1, npad), jnp.float32).at[:, : b.shape[1]].set(b)
        flat_inputs.append(wp.astype(jnp.bfloat16))
        flat_inputs.append(bp)
        # Whole-array, grid-invariant blocks -> fetched once, VMEM-resident.
        in_specs.append(pl.BlockSpec((kp, npad), lambda i: (0, 0)))
        in_specs.append(pl.BlockSpec((1, npad), lambda i: (0, 0)))

    kernel = functools.partial(_mlp_kernel, n_layers=n_layers)
    out_padded = pl.pallas_call(
        kernel,
        out_shape=jax.ShapeDtypeStruct((padded_batch, out_pad), jnp.float32),
        grid=grid,
        in_specs=in_specs,
        out_specs=pl.BlockSpec((tile_m, out_pad), lambda i: (i, 0)),
        compiler_params=pltpu.CompilerParams(
            dimension_semantics=("parallel",),      # megacore / v7x 2-TC sharding
            vmem_limit_bytes=32 * 1024 * 1024,      # explicit (raises v5e 16 MiB default)
        ),
    )(*flat_inputs)

    # TODO(synk): for per-step inference loops, keep the padded bf16 weights
    # VMEM-resident across pallas_calls (P10 cross-call prefetch) instead of
    # re-padding/casting per call.
    return out_padded[:batch, :out_dim]


# ---------------------------------------------------------------------------
# Module plumbing (mirrors WolpertingerActorSlate.__init__) and references.
# ---------------------------------------------------------------------------
def layer_dims(nn_dim, input_dim=50, slate_size=10):
    dims = []
    for i, _d in enumerate(nn_dim):
        if i == 0:
            dims.append((input_dim, nn_dim[0]))
        elif i == len(nn_dim) - 1:
            dims.append((nn_dim[i - 1], slate_size * 50))
        else:
            dims.append((nn_dim[i - 1], nn_dim[i]))
    return dims


def init_params(key, nn_dim, input_dim=50, slate_size=10):
    """PyTorch-Linear-like init: uniform(+-1/sqrt(fan_in)); W stored (in,out)."""
    params = []
    for fan_in, fan_out in layer_dims(nn_dim, input_dim, slate_size):
        key, kw, kb = jax.random.split(key, 3)
        bound = 1.0 / float(fan_in) ** 0.5
        w = jax.random.uniform(kw, (fan_in, fan_out), jnp.float32, -bound, bound)
        b = jax.random.uniform(kb, (1, fan_out), jnp.float32, -bound, bound)
        params.append((w, b))
    return params


def reference_forward(x, params, bf16_weights=True):
    """Pure-JAX reference.  With bf16_weights=True it mirrors the kernel's
    numerics (bf16-rounded weights/activations, f32 accumulation)."""
    def q(a):
        return a.astype(jnp.bfloat16).astype(jnp.float32) if bf16_weights else a

    h = q(x)
    n = len(params)
    for i, (w, b) in enumerate(params):
        y = h @ q(w) + b
        y = jnp.where(y > 0, y, NEG_SLOPE * y)
        h = y if i == n - 1 else q(y)
    return h


if __name__ == "__main__":
    key = jax.random.PRNGKey(0)

    nn_dim = [32, 64, 32]     # last layer output is forced to slate_size*50 = 500
    input_dim = 50
    slate_size = 10
    batch = 2                 # small example batch (k=5 is unused in forward)

    key, kx, kp = jax.random.split(key, 3)
    x = jax.random.normal(kx, (batch, input_dim), dtype=jnp.float32)
    params = init_params(kp, nn_dim, input_dim=input_dim, slate_size=slate_size)

    # --- small batch (single tile) ---
    out = wolpertinger_actor_slate_forward(x, params)
    out = jax.block_until_ready(out)
    ref = reference_forward(x, params)
    assert out.shape == (batch, slate_size * 50), out.shape
    assert jnp.allclose(out, ref, atol=2e-3, rtol=2e-3), "mismatch vs reference (small batch)"

    # --- larger batch exercising the multi-tile parallel grid ---
    key, kx2 = jax.random.split(key)
    big_batch = 300
    x_big = jax.random.normal(kx2, (big_batch, input_dim), dtype=jnp.float32)
    out_big = wolpertinger_actor_slate_forward(x_big, params, max_tile_m=128)
    out_big = jax.block_until_ready(out_big)
    ref_big = reference_forward(x_big, params)
    assert out_big.shape == (big_batch, slate_size * 50), out_big.shape
    assert jnp.allclose(out_big, ref_big, atol=2e-3, rtol=2e-3), "mismatch vs reference (big batch)"

    print("KERNEL_OK")
</pallas_src>

<mosaic_0001>
module attributes {stable_mosaic.version = 11 : i64} {
  func.func @_mlp_kernel(%arg0: i32, %arg1: memref<16x128xbf16, #tpu.memory_space<vmem>>, %arg2: memref<128x128xbf16, #tpu.memory_space<vmem>>, %arg3: memref<1x128xf32, #tpu.memory_space<vmem>>, %arg4: memref<128x128xbf16, #tpu.memory_space<vmem>>, %arg5: memref<1x128xf32, #tpu.memory_space<vmem>>, %arg6: memref<128x512xbf16, #tpu.memory_space<vmem>>, %arg7: memref<1x512xf32, #tpu.memory_space<vmem>>, %arg8: memref<16x512xf32, #tpu.memory_space<vmem>>) attributes {dimension_semantics = [#tpu.dimension_semantics<parallel>], iteration_bounds = array<i64: 1>, scalar_prefetch = 0 : i64, scratch_operands = 0 : i64, tpu.core_type = #tpu.core_type<tc>, window_params = [{transform_indices = @transform_0, window_bounds = array<i64: 16, 128>}, {pipeline_mode = #tpu.pipeline_mode<synchronous>, transform_indices = @transform_1, window_bounds = array<i64: 128, 128>}, {pipeline_mode = #tpu.pipeline_mode<synchronous>, transform_indices = @transform_2, window_bounds = array<i64: 1, 128>}, {pipeline_mode = #tpu.pipeline_mode<synchronous>, transform_indices = @transform_3, window_bounds = array<i64: 128, 128>}, {pipeline_mode = #tpu.pipeline_mode<synchronous>, transform_indices = @transform_4, window_bounds = array<i64: 1, 128>}, {pipeline_mode = #tpu.pipeline_mode<synchronous>, transform_indices = @transform_5, window_bounds = array<i64: 128, 512>}, {pipeline_mode = #tpu.pipeline_mode<synchronous>, transform_indices = @transform_6, window_bounds = array<i64: 1, 512>}, {transform_indices = @transform_7, window_bounds = array<i64: 16, 512>}]} {
    %c0 = arith.constant 0 : index
    %c0_0 = arith.constant 0 : index
    %0 = vector.load %arg1[%c0, %c0_0] : memref<16x128xbf16, #tpu.memory_space<vmem>>, vector<16x128xbf16>
    %c0_1 = arith.constant 0 : index
    %c0_2 = arith.constant 0 : index
    %1 = vector.load %arg2[%c0_1, %c0_2] : memref<128x128xbf16, #tpu.memory_space<vmem>>, vector<128x128xbf16>
    %c0_3 = arith.constant 0 : index
    %c0_4 = arith.constant 0 : index
    %2 = vector.load %arg3[%c0_3, %c0_4] : memref<1x128xf32, #tpu.memory_space<vmem>>, vector<1x128xf32>
    %cst = arith.constant dense<0.000000e+00> : vector<16x128xf32>
    %3 = tpu.matmul %0, %1, %cst {dimension_numbers = #tpu.dot_dimension_numbers<[1], [0], [0], [1], [0, 0, 1, 1], [], []>} : vector<16x128xbf16>, vector<128x128xbf16>, vector<16x128xf32> -> vector<16x128xf32>
    %4 = vector.broadcast %2 : vector<1x128xf32> to vector<16x128xf32>
    %5 = arith.addf %3, %4 : vector<16x128xf32>
    %cst_5 = arith.constant 0.000000e+00 : f32
    %6 = vector.broadcast %cst_5 : f32 to vector<16x128xf32>
    %7 = arith.cmpf ogt, %5, %6 : vector<16x128xf32>
    %cst_6 = arith.constant 0.00999999977 : f32
    %8 = vector.broadcast %cst_6 : f32 to vector<16x128xf32>
    %9 = arith.mulf %8, %5 : vector<16x128xf32>
    %10 = arith.select %7, %5, %9 : vector<16x128xi1>, vector<16x128xf32>
    %11 = arith.truncf %10 : vector<16x128xf32> to vector<16x128xbf16>
    %c0_7 = arith.constant 0 : index
    %c0_8 = arith.constant 0 : index
    %12 = vector.load %arg4[%c0_7, %c0_8] : memref<128x128xbf16, #tpu.memory_space<vmem>>, vector<128x128xbf16>
    %c0_9 = arith.constant 0 : index
    %c0_10 = arith.constant 0 : index
    %13 = vector.load %arg5[%c0_9, %c0_10] : memref<1x128xf32, #tpu.memory_space<vmem>>, vector<1x128xf32>
    %cst_11 = arith.constant dense<0.000000e+00> : vector<16x128xf32>
    %14 = tpu.matmul %11, %12, %cst_11 {dimension_numbers = #tpu.dot_dimension_numbers<[1], [0], [0], [1], [0, 0, 1, 1], [], []>} : vector<16x128xbf16>, vector<128x128xbf16>, vector<16x128xf32> -> vector<16x128xf32>
    %15 = vector.broadcast %13 : vector<1x128xf32> to vector<16x128xf32>
    %16 = arith.addf %14, %15 : vector<16x128xf32>
    %cst_12 = arith.constant 0.000000e+00 : f32
    %17 = vector.broadcast %cst_12 : f32 to vector<16x128xf32>
    %18 = arith.cmpf ogt, %16, %17 : vector<16x128xf32>
    %cst_13 = arith.constant 0.00999999977 : f32
    %19 = vector.broadcast %cst_13 : f32 to vector<16x128xf32>
    %20 = arith.mulf %19, %16 : vector<16x128xf32>
    %21 = arith.select %18, %16, %20 : vector<16x128xi1>, vector<16x128xf32>
    %22 = arith.truncf %21 : vector<16x128xf32> to vector<16x128xbf16>
    %c0_14 = arith.constant 0 : index
    %c0_15 = arith.constant 0 : index
    %23 = vector.load %arg6[%c0_14, %c0_15] : memref<128x512xbf16, #tpu.memory_space<vmem>>, vector<128x512xbf16>
    %c0_16 = arith.constant 0 : index
    %c0_17 = arith.constant 0 : index
    %24 = vector.load %arg7[%c0_16, %c0_17] : memref<1x512xf32, #tpu.memory_space<vmem>>, vector<1x512xf32>
    %cst_18 = arith.constant dense<0.000000e+00> : vector<16x512xf32>
    %25 = tpu.matmul %22, %23, %cst_18 {dimension_numbers = #tpu.dot_dimension_numbers<[1], [0], [0], [1], [0, 0, 1, 1], [], []>} : vector<16x128xbf16>, vector<128x512xbf16>, vector<16x512xf32> -> vector<16x512xf32>
    %26 = vector.broadcast %24 : vector<1x512xf32> to vector<16x512xf32>
    %27 = arith.addf %25, %26 : vector<16x512xf32>
    %cst_19 = arith.constant 0.000000e+00 : f32
    %28 = vector.broadcast %cst_19 : f32 to vector<16x512xf32>
    %29 = arith.cmpf ogt, %27, %28 : vector<16x512xf32>
    %cst_20 = arith.constant 0.00999999977 : f32
    %30 = vector.broadcast %cst_20 : f32 to vector<16x512xf32>
    %31 = arith.mulf %30, %27 : vector<16x512xf32>
    %32 = arith.select %29, %27, %31 : vector<16x512xi1>, vector<16x512xf32>
    %c0_21 = arith.constant 0 : index
    %c0_22 = arith.constant 0 : index
    %33 = vector.load %arg8[%c0_21, %c0_22] : memref<16x512xf32, #tpu.memory_space<vmem>>, vector<16x512xf32>
    tpu.vector_store %arg8[%c0_21, %c0_22], %32 {strides = array<i32>} : memref<16x512xf32, #tpu.memory_space<vmem>>, vector<16x512xf32>,
    return
  }
  func.func @transform_0(%arg0: i32) -> (i32, i32) {
    %c0_i32 = arith.constant 0 : i32
    %c0_i32_0 = arith.constant 0 : i32
    return %arg0, %c0_i32 : i32, i32
  }
  func.func @transform_1(%arg0: i32) -> (i32, i32) {
    %c0_i32 = arith.constant 0 : i32
    %c0_i32_0 = arith.constant 0 : i32
    %c0_i32_1 = arith.constant 0 : i32
    return %c0_i32, %c0_i32_0 : i32, i32
  }
  func.func @transform_2(%arg0: i32) -> (i32, i32) {
    %c0_i32 = arith.constant 0 : i32
    %c0_i32_0 = arith.constant 0 : i32
    %c0_i32_1 = arith.constant 0 : i32
    return %c0_i32, %c0_i32_0 : i32, i32
  }
  func.func @transform_3(%arg0: i32) -> (i32, i32) {
    %c0_i32 = arith.constant 0 : i32
    %c0_i32_0 = arith.constant 0 : i32
    %c0_i32_1 = arith.constant 0 : i32
    return %c0_i32, %c0_i32_0 : i32, i32
  }
  func.func @transform_4(%arg0: i32) -> (i32, i32) {
    %c0_i32 = arith.constant 0 : i32
    %c0_i32_0 = arith.constant 0 : i32
    %c0_i32_1 = arith.constant 0 : i32
    return %c0_i32, %c0_i32_0 : i32, i32
  }
  func.func @transform_5(%arg0: i32) -> (i32, i32) {
    %c0_i32 = arith.constant 0 : i32
    %c0_i32_0 = arith.constant 0 : i32
    %c0_i32_1 = arith.constant 0 : i32
    return %c0_i32, %c0_i32_0 : i32, i32
  }
  func.func @transform_6(%arg0: i32) -> (i32, i32) {
    %c0_i32 = arith.constant 0 : i32
    %c0_i32_0 = arith.constant 0 : i32
    %c0_i32_1 = arith.constant 0 : i32
    return %c0_i32, %c0_i32_0 : i32, i32
  }
  func.func @transform_7(%arg0: i32) -> (i32, i32) {
    %c0_i32 = arith.constant 0 : i32
    %c0_i32_0 = arith.constant 0 : i32
    return %arg0, %c0_i32 : i32, i32
  }
}

</mosaic_0001>

<bundles_post_ra>
// kernel: tpu_custom_call.1
= control target key start
LH: loop header
LB: loop body
LE: loop exit
PB: predicated region body
PF: predicated region fallthrough
CT: control target
= control target key end

     0   :  { %12 = vsyncpa [#allocation3], 0  ;;  %s1132_s0 = inlined_call_operand.hbm [shape: bf16[16,128], index: 0, kind: input, shape index: {}]   ;;  %s1133_s1 = inlined_call_operand.hbm [shape: bf16[128,128], index: 1, kind: input, shape index: {}]   ;;  %s1134_s2 = inlined_call_operand.vmem [shape: f32[1,128], index: 2, kind: input, shape index: {}]   ;;  %s1135_s3 = inlined_call_operand.hbm [shape: bf16[128,128], index: 3, kind: input, shape index: {}]   ;;  %s1136_s4 = inlined_call_operand.vmem [shape: f32[1,128], index: 4, kind: input, shape index: {}]   ;;  %s1137_s5 = inlined_call_operand.hbm [shape: bf16[128,512], index: 5, kind: input, shape index: {}]   ;;  %s1138_s6 = inlined_call_operand.vmem [shape: f32[1,512], index: 6, kind: input, shape index: {}]   ;;  %s1139_s7 = inlined_call_operand.hbm [shape: f32[16,512], index: 7, kind: output, shape index: {}]  }
   0x1   :  { %13 = vsyncpa [#allocation6], 0 }
   0x2   :  { %14 = vsyncpa [#allocation9], 0 }
   0x3   :  { %15 = vsyncpa [#allocation4], 0  ;;  %s986_s24 = smov [#allocation5]   ;;  %s987_s26 = smov [#allocation2]  }
   0x4   :  { %s33_s25 = sshll.u32 %s986_s24, 4  ;;  %s21_s27 = sshll.u32 %s987_s26, 4  ;;  %s34_s25 = int_to_ptr.vmem [resolvable:$true] %s33_s25  ;;  %s1040_s27 = int_to_ptr.vmem [resolvable:$true] %s21_s27 }
   0x5   :  { %s868_s30 = scalar_lea.hbm %s1133_s1, 1024 }
   0x6   :  { %p869_p0 = scmp.ne.s32.totalorder %s1133_s1, %s868_s30  ;;  %p872_p1 = scmp.lt.u32.totalorder %s868_s30, %s1133_s1 }
   0x8   :  { %p874_p2 = pnand %p872_p1, %p869_p0 }
   0xa   :  { %877 = shalt.err (!%p874_p2)
}
   0xb   :  { %s878_s12 = scalar_lea.vmem %s34_s25, 1024  ;;  %p883_p4 = scmp.lt.s32.totalorder %s34_s25, %s34_s25 }
   0xc   :  { %p879_p3 = scmp.ne.s32.totalorder %s34_s25, %s878_s12  ;;  %p884_p5 = scmp.lt.s32.totalorder %s878_s12, %s878_s12 }
   0xe   :  { %p885_p6 = por %p884_p5, %p883_p4 }
  0x10   :  { %p886_p7 = pnand %p885_p6, %p879_p3 }
  0x12   :  { %889 = shalt.err (!%p886_p7)
}
  0x13   :  { %s988_s13 = smov 64   ;;  %s989_s14 = smov 4  }
  0x14   :  { %39 = dma.hbm_to_vmem [thread:$0]  %s1133_s1, 1024, %s34_s25, [#allocation6], %s988_s13, %s988_s13, %s989_s14  }
  0x15   :  { %s890_s19 = scalar_lea.hbm %s1132_s0, 128 }
  0x16   :  { %p891_p8 = scmp.ne.s32.totalorder %s1132_s0, %s890_s19  ;;  %p894_p9 = scmp.lt.u32.totalorder %s890_s19, %s1132_s0 }
  0x18   :  { %p896_p10 = pnand %p894_p9, %p891_p8 }
  0x1a   :  { %899 = shalt.err (!%p896_p10)
}
  0x1b   :  { %s900_s24 = scalar_lea.vmem %s1040_s27, 128  ;;  %p905_p12 = scmp.lt.s32.totalorder %s1040_s27, %s1040_s27 }
  0x1c   :  { %p901_p11 = scmp.ne.s32.totalorder %s1040_s27, %s900_s24  ;;  %p906_p13 = scmp.lt.s32.totalorder %s900_s24, %s900_s24 }
  0x1e   :  { %p907_p0 = por %p906_p13, %p905_p12 }
  0x20   :  { %p908_p1 = pnand %p907_p0, %p901_p11 }
  0x22   :  { %911 = shalt.err (!%p908_p1)
}
  0x23   :  { %27 = dma.hbm_to_vmem [thread:$0]  %s1132_s0, 128, %s1040_s27, [#allocation3], %s988_s13, %s988_s13, %s989_s14  }
  0x24   :  { %s990_s26 = smov [#allocation7]   ;;  %s991_s29 = smov [#allocation8]  }
  0x25   :  { %s47_s28 = sshll.u32 %s990_s26, 4  ;;  %s61_s30 = sshll.u32 %s991_s29, 4  ;;  %s48_s28 = int_to_ptr.vmem [resolvable:$true] %s47_s28  ;;  %s1077_s30 = int_to_ptr.vmem [resolvable:$true] %s61_s30 }
  0x26   :  { %s912_s10 = scalar_lea.hbm %s1135_s3, 1024 }
  0x27   :  { %p913_p2 = scmp.ne.s32.totalorder %s1135_s3, %s912_s10  ;;  %p916_p3 = scmp.lt.u32.totalorder %s912_s10, %s1135_s3 }
  0x29   :  { %p918_p4 = pnand %p916_p3, %p913_p2 }
  0x2b   :  { %921 = shalt.err (!%p918_p4)
}
  0x2c   :  { %s922_s0 = scalar_lea.vmem %s48_s28, 1024  ;;  %p927_p6 = scmp.lt.s32.totalorder %s48_s28, %s48_s28 }
  0x2d   :  { %p923_p5 = scmp.ne.s32.totalorder %s48_s28, %s922_s0  ;;  %p928_p7 = scmp.lt.s32.totalorder %s922_s0, %s922_s0 }
  0x2f   :  { %p929_p8 = por %p928_p7, %p927_p6 }
  0x31   :  { %p930_p9 = pnand %p929_p8, %p923_p5 }
  0x33   :  { %933 = shalt.err (!%p930_p9)
}
  0x34   :  { %53 = dma.hbm_to_vmem [thread:$0]  %s1135_s3, 1024, %s48_s28, [#allocation6], %s988_s13, %s988_s13, %s989_s14  }
  0x35   :  { %s934_s20 = scalar_lea.hbm %s1137_s5, 4096 }
  0x36   :  { %p935_p10 = scmp.ne.s32.totalorder %s1137_s5, %s934_s20  ;;  %p938_p11 = scmp.lt.u32.totalorder %s934_s20, %s1137_s5 }
  0x38   :  { %p940_p12 = pnand %p938_p11, %p935_p10 }
  0x3a   :  { %943 = shalt.err (!%p940_p12)
}
  0x3b   :  { %s944_s1 = scalar_lea.vmem %s1077_s30, 4096  ;;  %p949_p0 = scmp.lt.s32.totalorder %s1077_s30, %s1077_s30 }
  0x3c   :  { %p945_p13 = scmp.ne.s32.totalorder %s1077_s30, %s944_s1  ;;  %p950_p1 = scmp.lt.s32.totalorder %s944_s1, %s944_s1 }
  0x3e   :  { %p951_p2 = por %p950_p1, %p949_p0 }
  0x40   :  { %p952_p3 = pnand %p951_p2, %p945_p13 }
  0x42   :  { %955 = shalt.err (!%p952_p3)
}
  0x43   :  { %s992_s3 = smov 256   ;;  %s993_s13 = smov 16  }
  0x44   :  { %67 = dma.hbm_to_vmem [thread:$0]  %s1137_s5, 4096, %s1077_s30, [#allocation9], %s992_s3, %s992_s3, %s993_s13  }
  0x45   :  { %978 = dma.done.wait [#allocation3], 128  }
  0x46   :  { %979 = vsyncadd [#allocation3], 4294967168 }
  0x47   :  { %980 = dma.done.wait [#allocation6], 2048  }
  0x48   :  { %981 = vsyncadd [#allocation6], 4294965248 }
  0x49   :  { %982 = dma.done.wait [#allocation9], 4096  }
  0x4a   :  { %983 = vsyncadd [#allocation9], 4294963200  ;;  %v994_v0 = vmov 0.0   ;;  %vm995_vm0 = vmmov 0   ;;  %v803_v1 = vld [vmem:[#allocation5] sm:$0xff]   ;;  %v804_v2 = vld [vmem:[#allocation5 + $0x8] sm:$0xff]  }
  0x4b   :  { %749 = vmatprep.subr.bf16.mxu0 %v994_v0  ;;  %765 = vmatprep.mubr.msk.bf16.mxu0 %vm995_vm0, %v994_v0  ;;  %v805_v3 = vld [vmem:[#allocation5 + $0x10] sm:$0xff]   ;;  %v812_v4 = vld [vmem:[#allocation7] sm:$0xff]   ;;  %v806_v5 = vld [vmem:[#allocation5 + $0x18] sm:$0xff]   ;;  %v996_v62 = vmov 0  }
  0x4c   :  { %769 = vmatprep.subr.bf16.mxu1 %v994_v0  ;;  %785 = vmatprep.mubr.msk.bf16.mxu1 %vm995_vm0, %v994_v0  ;;  %v813_v6 = vld [vmem:[#allocation7 + $0x8] sm:$0xff]   ;;  %v807_v7 = vld [vmem:[#allocation5 + $0x20] sm:$0xff]   ;;  %v814_v8 = vld [vmem:[#allocation7 + $0x10] sm:$0xff]  }
  0x4d   :  { %750 = vmatpush3.bf16.msra.mxu0 %v803_v1  ;;  %770 = vmatpush3.bf16.msra.mxu1 %v812_v4  ;;  %v808_v9 = vld [vmem:[#allocation5 + $0x28] sm:$0xff]   ;;  %v815_v10 = vld [vmem:[#allocation7 + $0x18] sm:$0xff]   ;;  %v809_v11 = vld [vmem:[#allocation5 + $0x30] sm:$0xff]  }
  0x4e   :  { %751 = vmatprep.subr.bf16.mxu0 %v994_v0  ;;  %771 = vmatprep.subr.bf16.mxu1 %v994_v0  ;;  %v816_v12 = vld [vmem:[#allocation7 + $0x20] sm:$0xff]   ;;  %v810_v13 = vld [vmem:[#allocation5 + $0x38] sm:$0xff]   ;;  %v817_v14 = vld [vmem:[#allocation7 + $0x28] sm:$0xff]  }
  0x4f   :  { %v811_v15 = vld [vmem:[#allocation2] sm:$0xff]   ;;  %v818_v16 = vld [vmem:[#allocation7 + $0x30] sm:$0xff]  }
  0x50   :  { %v819_v17 = vld [vmem:[#allocation7 + $0x38] sm:$0xff]   ;;  %v820_v18 = vld [vmem:[#allocation8] ss:$16 sps:$4 sm:$0xff]   ;;  %v822_v19 = vld [vmem:[#allocation8 + $0x4] ss:$16 sps:$4 sm:$0xff]  }
  0x51   :  { %752 = vmatpush3.bf16.msra.mxu0 %v804_v2  ;;  %772 = vmatpush3.bf16.msra.mxu1 %v813_v6  ;;  %v825_v20 = vld [vmem:[#allocation8 + $0xc] ss:$16 sps:$4 sm:$0xff]   ;;  %v828_v21 = vld [vmem:[#allocation8 + $0x24] ss:$16 sps:$4 sm:$0xff]   ;;  %v826_v22 = vld [vmem:[#allocation8 + $0x20] ss:$16 sps:$4 sm:$0xff]  }
  0x52   :  { %753 = vmatprep.subr.bf16.mxu0 %v994_v0  ;;  %773 = vmatprep.subr.bf16.mxu1 %v994_v0  ;;  %v834_v23 = vld [vmem:[#allocation8 + $0x44] ss:$16 sps:$4 sm:$0xff]   ;;  %v832_v24 = vld [vmem:[#allocation8 + $0x40] ss:$16 sps:$4 sm:$0xff]   ;;  %v680_v31 = vld [vmem:[%s1134_s2] ss:$0 sm:$0xff] }
  0x53   :  { %v840_v25 = vld [vmem:[#allocation8 + $0x64] ss:$16 sps:$4 sm:$0xff]   ;;  %v838_v26 = vld [vmem:[#allocation8 + $0x60] ss:$16 sps:$4 sm:$0xff]   ;;  %v823_v42 = vld [vmem:[#allocation8 + $0x8] ss:$16 sps:$4 sm:$0xff]  }
  0x54   :  { %v846_v27 = vld [vmem:[#allocation8 + $0x84] ss:$16 sps:$4 sm:$0xff]   ;;  %v844_v28 = vld [vmem:[#allocation8 + $0x80] ss:$16 sps:$4 sm:$0xff]   ;;  %v831_v44 = vld [vmem:[#allocation8 + $0x2c] ss:$16 sps:$4 sm:$0xff]  }
  0x55   :  { %754 = vmatpush3.bf16.msra.mxu0 %v805_v3  ;;  %774 = vmatpush3.bf16.msra.mxu1 %v814_v8  ;;  %v852_v29 = vld [vmem:[#allocation8 + $0xa4] ss:$16 sps:$4 sm:$0xff]   ;;  %v850_v30 = vld [vmem:[#allocation8 + $0xa0] ss:$16 sps:$4 sm:$0xff]   ;;  %v829_v45 = vld [vmem:[#allocation8 + $0x28] ss:$16 sps:$4 sm:$0xff]  }
  0x56   :  { %755 = vmatprep.subr.bf16.mxu0 %v994_v0  ;;  %775 = vmatprep.subr.bf16.mxu1 %v994_v0  ;;  %v837_v46 = vld [vmem:[#allocation8 + $0x4c] ss:$16 sps:$4 sm:$0xff]   ;;  %v835_v47 = vld [vmem:[#allocation8 + $0x48] ss:$16 sps:$4 sm:$0xff]   ;;  %v858_v54 = vld [vmem:[#allocation8 + $0xc4] ss:$16 sps:$4 sm:$0xff]  }
  0x57   :  { %v843_v48 = vld [vmem:[#allocation8 + $0x6c] ss:$16 sps:$4 sm:$0xff]   ;;  %v841_v49 = vld [vmem:[#allocation8 + $0x68] ss:$16 sps:$4 sm:$0xff]   ;;  %v856_v56 = vld [vmem:[#allocation8 + $0xc0] ss:$16 sps:$4 sm:$0xff]  }
  0x58   :  { %v849_v50 = vld [vmem:[#allocation8 + $0x8c] ss:$16 sps:$4 sm:$0xff]   ;;  %v847_v51 = vld [vmem:[#allocation8 + $0x88] ss:$16 sps:$4 sm:$0xff]   ;;  %v864_v58 = vld [vmem:[#allocation8 + $0xe4] ss:$16 sps:$4 sm:$0xff]  }
  0x59   :  { %756 = vmatpush3.bf16.msra.mxu0 %v806_v5  ;;  %776 = vmatpush3.bf16.msra.mxu1 %v815_v10  ;;  %v855_v52 = vld [vmem:[#allocation8 + $0xac] ss:$16 sps:$4 sm:$0xff]   ;;  %v853_v53 = vld [vmem:[#allocation8 + $0xa8] ss:$16 sps:$4 sm:$0xff]   ;;  %v862_v60 = vld [vmem:[#allocation8 + $0xe0] ss:$16 sps:$4 sm:$0xff]  }
  0x5a   :  { %757 = vmatprep.subr.bf16.mxu0 %v994_v0  ;;  %777 = vmatprep.subr.bf16.mxu1 %v994_v0  ;;  %v861_v55 = vld [vmem:[#allocation8 + $0xcc] ss:$16 sps:$4 sm:$0xff]   ;;  %v859_v57 = vld [vmem:[#allocation8 + $0xc8] ss:$16 sps:$4 sm:$0xff]  }
  0x5b   :  { %v867_v59 = vld [vmem:[#allocation8 + $0xec] ss:$16 sps:$4 sm:$0xff]   ;;  %v865_v61 = vld [vmem:[#allocation8 + $0xe8] ss:$16 sps:$4 sm:$0xff]  }
  0x5c   :  { %v690_v63 = vld [vmem:[%s1136_s4] ss:$0 sm:$0xff] }
  0x5d   :  { %758 = vmatpush3.bf16.msra.mxu0 %v807_v7  ;;  %778 = vmatpush3.bf16.msra.mxu1 %v816_v12 }
  0x5e   :  { %759 = vmatprep.subr.bf16.mxu0 %v994_v0  ;;  %779 = vmatprep.subr.bf16.mxu1 %v994_v0 }
  0x61   :  { %760 = vmatpush3.bf16.msra.mxu0 %v808_v9  ;;  %780 = vmatpush3.bf16.msra.mxu1 %v817_v14 }
  0x62   :  { %761 = vmatprep.subr.bf16.mxu0 %v994_v0  ;;  %781 = vmatprep.subr.bf16.mxu1 %v994_v0 }
  0x65   :  { %762 = vmatpush3.bf16.msra.mxu0 %v809_v11  ;;  %782 = vmatpush3.bf16.msra.mxu1 %v818_v16  ;;  %v363_v11 = vlaneseq }
  0x66   :  { %763 = vmatprep.subr.bf16.mxu0 %v994_v0  ;;  %783 = vmatprep.subr.bf16.mxu1 %v994_v0 }
  0x67   :  { %v364_v12 = vshrl.u32 %v363_v11, 7 }
  0x69   :  { %764 = vmatpush3.bf16.msra.mxu0 %v810_v13  ;;  %784 = vmatpush3.bf16.msra.mxu1 %v819_v17  ;;  %v365_v13 = vsub.s32 0, %v364_v12  ;;  %v373_v14 = vsub.s32 2, %v364_v12  ;;  %v369_v16 = vsub.s32 1, %v364_v12  ;;  %v377_v17 = vsub.s32 3, %v364_v12 }
  0x6a   :  { %543 = vmatprep.subr.bf16.mxu0 %v822_v19  ;;  %586 = vmatprep.subr.bf16.mxu1 %v825_v20 }
  0x6c   :  { %766 = vmatmul.mubr.bf16.vlgmr.msra.gmra.mrb[0].mxu0 %v811_v15  ;;  %v361_v15 = vld [vmem:[%s1138_s6] sm:$0xf]  ;;  %s997_s6 = smov [#allocation10]  }
  0x6d   :  { %544 = vmatpush1.bf16.msra.mxu0 %v820_v18  ;;  %575 = vmatprep.mubr.bf16.mxu0 %v996_v62  ;;  %v366_v18 = vrot.slane %v361_v15, %v365_v13  ;;  %v374_v19 = vrot.slane %v361_v15, %v373_v14  ;;  %v370_v20 = vrot.slane %v361_v15, %v369_v16  ;;  %s666_s30 = sshll.u32 %s997_s6, 4  ;;  %s667_s30 = int_to_ptr.vmem [resolvable:$true] %s666_s30 }
  0x6e   :  { %545 = vmatprep.subr.bf16.mxu0 %v828_v21  ;;  %v378_v21 = vrot.slane %v361_v15, %v377_v17  ;;  %s956_s8 = scalar_lea.vmem %s667_s30, 1024  ;;  %p961_p5 = scmp.lt.s32.totalorder %s667_s30, %s667_s30 }
  0x6f   :  { %p957_p4 = scmp.ne.s32.totalorder %s667_s30, %s956_s8  ;;  %p962_p6 = scmp.lt.s32.totalorder %s956_s8, %s956_s8 }
  0x71   :  { %546 = vmatpush1.bf16.msra.mxu0 %v826_v22  ;;  %p963_p7 = por %p962_p6, %p961_p5 }
  0x72   :  { %547 = vmatprep.subr.bf16.mxu0 %v834_v23 }
  0x73   :  { %p964_p8 = pnand %p963_p7, %p957_p4 }
  0x75   :  { %548 = vmatpush1.bf16.msra.mxu0 %v832_v24 }
  0x76   :  { %549 = vmatprep.subr.bf16.mxu0 %v840_v25 }
  0x79   :  { %550 = vmatpush1.bf16.msra.mxu0 %v838_v26 }
  0x7a   :  { %551 = vmatprep.subr.bf16.mxu0 %v846_v27 }
  0x7d   :  { %552 = vmatpush1.bf16.msra.mxu0 %v844_v28 }
  0x7e   :  { %553 = vmatprep.subr.bf16.mxu0 %v852_v29 }
  0x81   :  { %554 = vmatpush1.bf16.msra.mxu0 %v850_v30 }
  0x82   :  { %555 = vmatprep.subr.bf16.mxu0 %v858_v54 }
  0x85   :  { %556 = vmatpush1.bf16.msra.mxu0 %v856_v56 }
  0x86   :  { %557 = vmatprep.subr.bf16.mxu0 %v864_v58 }
  0x89   :  { %558 = vmatpush1.bf16.msra.mxu0 %v862_v60 }
 0x13f   :  { %v196_v32 = vpop.f32.mrb[0].mxu0 }
 0x140   :  { %v197_v33 = vadd.f32 %v680_v31, %v196_v32  ;;  %v767_v34 = vpop.f32.mrb[1].mxu0 }
 0x141   :  { %v199_v35 = vpop.f32.mrb[2].mxu0 }
 0x142   :  { %v205_v36 = vmul.f32 0.01, %v197_v33  ;;  %v200_v37 = vadd.f32 %v680_v31, %v199_v35  ;;  %v768_v38 = vpop.f32.mrb[3].mxu0  ;;  %vm203_vm1 = vcmp.gt.f32.partialorder %v197_v33, 0.0 }
 0x144   :  { %vm204_vm2 = vcmp.gt.f32.partialorder %v200_v37, 0.0  ;;  %v206_v39 = vmul.f32 0.01, %v200_v37  ;;  %v207_v40 = vsel %vm203_vm1, %v197_v33, %v205_v36 }
 0x146   :  { %v208_v41 = vsel %vm204_vm2, %v200_v37, %v206_v39 }
 0x147   :  { %v209_v43 = vpack.c.bf16 %v208_v41, %v207_v40 }
 0x149   :  { %786 = vmatmul.mubr.bf16.vlgmr.msra.gmra.mrb[0].mxu1 %v209_v43 }
 0x14a   :  { %587 = vmatpush1.bf16.msra.mxu1 %v823_v42  ;;  %618 = vmatprep.mubr.bf16.mxu1 %v996_v62 }
 0x14b   :  { %588 = vmatprep.subr.bf16.mxu1 %v831_v44 }
 0x14e   :  { %589 = vmatpush1.bf16.msra.mxu1 %v829_v45 }
 0x14f   :  { %590 = vmatprep.subr.bf16.mxu1 %v837_v46 }
 0x152   :  { %591 = vmatpush1.bf16.msra.mxu1 %v835_v47 }
 0x153   :  { %592 = vmatprep.subr.bf16.mxu1 %v843_v48 }
 0x156   :  { %593 = vmatpush1.bf16.msra.mxu1 %v841_v49 }
 0x157   :  { %594 = vmatprep.subr.bf16.mxu1 %v849_v50 }
 0x15a   :  { %595 = vmatpush1.bf16.msra.mxu1 %v847_v51 }
 0x15b   :  { %596 = vmatprep.subr.bf16.mxu1 %v855_v52 }
 0x15e   :  { %597 = vmatpush1.bf16.msra.mxu1 %v853_v53 }
 0x15f   :  { %598 = vmatprep.subr.bf16.mxu1 %v861_v55 }
 0x162   :  { %599 = vmatpush1.bf16.msra.mxu1 %v859_v57 }
 0x163   :  { %600 = vmatprep.subr.bf16.mxu1 %v867_v59 }
 0x166   :  { %601 = vmatpush1.bf16.msra.mxu1 %v865_v61 }
 0x21c   :  { %v315_v0 = vpop.f32.mrb[0].mxu1 }
 0x21d   :  { %v316_v1 = vadd.f32 %v690_v63, %v315_v0  ;;  %v787_v2 = vpop.f32.mrb[1].mxu1 }
 0x21e   :  { %v318_v3 = vpop.f32.mrb[2].mxu1 }
 0x21f   :  { %v324_v4 = vmul.f32 0.01, %v316_v1  ;;  %v319_v5 = vadd.f32 %v690_v63, %v318_v3  ;;  %v788_v6 = vpop.f32.mrb[3].mxu1  ;;  %vm322_vm3 = vcmp.gt.f32.partialorder %v316_v1, 0.0 }
 0x221   :  { %vm323_vm4 = vcmp.gt.f32.partialorder %v319_v5, 0.0  ;;  %v325_v7 = vmul.f32 0.01, %v319_v5  ;;  %v326_v8 = vsel %vm322_vm3, %v316_v1, %v324_v4 }
 0x223   :  { %v327_v9 = vsel %vm323_vm4, %v319_v5, %v325_v7 }
 0x224   :  { %v328_v10 = vpack.c.bf16 %v327_v9, %v326_v8 }
 0x226   :  { %576 = vmatmul.mubr.bf16.vlgmr.msra.gmra.mrb[4].mxu0 %v328_v10  ;;  %619 = vmatmul.mubr.bf16.vlgmr.msra.gmra.mrb[4].mxu1 %v328_v10 }
 0x2f9   :  { %v577_v22 = vpop.f32.mrb[4].mxu0  ;;  %v620_v23 = vpop.f32.mrb[4].mxu1 }
 0x2fa   :  { %v578_v24 = vadd.f32 %v577_v22, %v366_v18  ;;  %v621_v25 = vadd.f32 %v620_v23, %v374_v19  ;;  %v579_v26 = vpop.f32.mrb[5].mxu0  ;;  %v622_v27 = vpop.f32.mrb[5].mxu1 }
 0x2fb   :  { %v580_v28 = vadd.f32 %v579_v26, %v370_v20  ;;  %v623_v29 = vadd.f32 %v622_v27, %v378_v21  ;;  %v581_v30 = vpop.f32.mrb[6].mxu0  ;;  %v624_v31 = vpop.f32.mrb[6].mxu1 }
 0x2fc   :  { %vm629_vm5 = vcmp.gt.f32.partialorder %v578_v24, 0.0  ;;  %v637_v32 = vmul.f32 0.01, %v578_v24  ;;  %vm631_vm6 = vcmp.gt.f32.partialorder %v621_v25, 0.0  ;;  %v639_v33 = vmul.f32 0.01, %v621_v25 }
 0x2fd   :  { %vm630_vm7 = vcmp.gt.f32.partialorder %v580_v28, 0.0  ;;  %v638_v34 = vmul.f32 0.01, %v580_v28  ;;  %vm632_vm8 = vcmp.gt.f32.partialorder %v623_v29, 0.0  ;;  %v640_v35 = vmul.f32 0.01, %v623_v29 }
 0x2fe   :  { %v645_v36 = vsel %vm629_vm5, %v578_v24, %v637_v32  ;;  %v647_v37 = vsel %vm631_vm6, %v621_v25, %v639_v33  ;;  %v582_v38 = vadd.f32 %v581_v30, %v366_v18  ;;  %v625_v39 = vadd.f32 %v624_v31, %v374_v19  ;;  %v583_v40 = vpop.f32.mrb[7].mxu0  ;;  %v626_v41 = vpop.f32.mrb[7].mxu1 }
 0x2ff   :  { %653 = vst [vmem:[#allocation10] sm:$0xff] %v645_v36  ;;  %655 = vst [vmem:[#allocation10 + $0x10] sm:$0xff] %v647_v37  ;;  %v646_v42 = vsel %vm630_vm7, %v580_v28, %v638_v34  ;;  %v648_v43 = vsel %vm632_vm8, %v623_v29, %v640_v35  ;;  %v584_v44 = vadd.f32 %v583_v40, %v370_v20 }
 0x300   :  { %v627_v45 = vadd.f32 %v626_v41, %v378_v21  ;;  %654 = vst [vmem:[#allocation10 + $0x8] sm:$0xff] %v646_v42  ;;  %656 = vst [vmem:[#allocation10 + $0x18] sm:$0xff] %v648_v43  ;;  %vm633_vm9 = vcmp.gt.f32.partialorder %v582_v38, 0.0  ;;  %v641_v46 = vmul.f32 0.01, %v582_v38  ;;  %vm635_vm10 = vcmp.gt.f32.partialorder %v625_v39, 0.0 }
 0x301   :  { %v643_v47 = vmul.f32 0.01, %v625_v39  ;;  %vm634_vm11 = vcmp.gt.f32.partialorder %v584_v44, 0.0  ;;  %v642_v48 = vmul.f32 0.01, %v584_v44 }
 0x302   :  { %vm636_vm12 = vcmp.gt.f32.partialorder %v627_v45, 0.0  ;;  %v644_v49 = vmul.f32 0.01, %v627_v45  ;;  %v649_v50 = vsel %vm633_vm9, %v582_v38, %v641_v46 }
 0x303   :  { %v651_v51 = vsel %vm635_vm10, %v625_v39, %v643_v47  ;;  %657 = vst [vmem:[#allocation10 + $0x20] sm:$0xff] %v649_v50  ;;  %v650_v52 = vsel %vm634_vm11, %v584_v44, %v642_v48 }
 0x304   :  { %659 = vst [vmem:[#allocation10 + $0x30] sm:$0xff] %v651_v51  ;;  %v652_v53 = vsel %vm636_vm12, %v627_v45, %v644_v49  ;;  %658 = vst [vmem:[#allocation10 + $0x28] sm:$0xff] %v650_v52 }
 0x305   :  { %660 = vst [vmem:[#allocation10 + $0x38] sm:$0xff] %v652_v53 }
 0x306   :  { %967 = shalt.err (!%p964_p8)
}
 0x307   :  { %s968_s11 = scalar_lea.hbm %s1139_s7, 1024 }
 0x308   :  { %p969_p9 = scmp.ne.s32.totalorder %s1139_s7, %s968_s11  ;;  %p972_p10 = scmp.lt.u32.totalorder %s968_s11, %s1139_s7 }
 0x30a   :  { %p974_p11 = pnand %p972_p10, %p969_p9 }
 0x30c   :  { %977 = shalt.err (!%p974_p11)
}
 0x30d   :  { %s998_s27 = smov 512   ;;  %s999_s17 = smov 32  }
 0x30e   :  { %672 = dma.vmem_to_hbm [thread:$0]  %s667_s30, 1024, %s1139_s7, [#allocation4], %s998_s27, %s998_s27, %s999_s17  }
 0x30f   :  { %984 = dma.done.wait [#allocation4], 1024  }
 0x310   :  { %985 = vsyncadd [#allocation4], 4294966272 }
 0x311   :  { %676 = vsyncpa [#allocation3], 1 }
 0x312   :  { %677 = vsyncpa [#allocation6], 1 }
 0x313   :  { %678 = vsyncpa [#allocation9], 1 }
 0x314   :  { %679 = vsyncpa [#allocation4], 1 }

</bundles_post_ra>
